<compile_context>
chip_gen: v6e
topology: v6e:2x2x1
jax: 0.10.0
libtpu: 0.0.40
codegen_flags: <defaults>
</compile_context>

<pallas_src>
import functools

import jax
import jax.numpy as jnp
from jax.experimental import pallas as pl
from jax.experimental.pallas import tpu as pltpu


def _round_up(n, m):
    return ((n + m - 1) // m) * m


def _fm_kernel(x_ref, faug_ref, b_ref, o_ref, *, num_factors):
    # x_ref    : (TB, D)     batch tile (batch -> sublanes, features -> lanes)
    # faug_ref : (D, K + 2)  resident weights: [factor | w.T | sum_k factor^2]
    # b_ref    : (1,)        linear bias (SMEM scalar)
    # o_ref    : (TB, 1)     output tile
    k = num_factors
    x = x_ref[...].astype(jnp.float32)          # upcast once (bf16-safe on v5e VPU)
    x2 = x * x
    faug = faug_ref[...]                        # (D, K+2) f32

    # Fused MXU pass: cols [0, K) = x @ F, col K = x @ w.T (col K+1 is unused
    # here -- it rides in lanes the MXU pads to 128 anyway).
    g = jnp.dot(x, faug, preferred_element_type=jnp.float32)               # (TB, K+2)
    # sum_k (x^2 @ F^2)_k == x^2 @ (sum_k F^2): a single N=1 matmul on col K+1.
    h = jnp.dot(x2, faug[:, k + 1:], preferred_element_type=jnp.float32)   # (TB, 1)

    xf = g[:, :k]                                               # (TB, K)
    lin = g[:, k:k + 1]                                         # (TB, 1)
    fm = 0.5 * (jnp.sum(xf * xf, axis=1, keepdims=True) - h)    # (TB, 1)
    o_ref[...] = (lin + fm + b_ref[0]).astype(o_ref.dtype)


def fm_forward(x, w, b, factor, *, batch_tile=None):
    """FM forward. x: (B, D) f32/bf16; w: (1, D); b: (1,)/(1,1); factor: (D, K) -> (B,)."""
    B, D = x.shape
    K = factor.shape[1]
    x_itemsize = int(jnp.dtype(x.dtype).itemsize)

    # ---- wrapper-side preprocessing (weights only; x is streamed untouched) ----
    f32 = jnp.float32
    f2sum = jnp.sum(factor.astype(f32) ** 2, axis=1, keepdims=True)            # (D, 1)
    f_aug = jnp.concatenate(
        [factor.astype(f32), jnp.transpose(w).astype(f32), f2sum], axis=1)     # (D, K+2)
    bias = jnp.reshape(b, (1,)).astype(f32)

    # ---- VMEM budget: ~3/4 of this chip generation's physical VMEM ----
    try:
        vmem_phys = int(pltpu.get_tpu_info().vmem_capacity_bytes)
    except Exception:
        vmem_phys = 64 * 1024 * 1024            # conservative (v7x-sized) fallback
    vmem_limit = int(min(vmem_phys * 3 // 4, 96 * 1024 * 1024))

    # ---- batch tile heuristic: count ALL VMEM consumers -----------------------
    #   x tile   : TB * D * itemsize                  (x2 double-buffer)
    #   out tile : TB * 128 * 4   (1-wide lane-pads to 128; x2 buffers)
    #   weights  : round_up(D,8) * 128 * 4   (K+2 lanes pad to 128; x2 buffers)
    if batch_tile is None:
        nbuf = 2
        weights_bytes = _round_up(D, 8) * 128 * 4 * nbuf
        slack = 2 * 1024 * 1024                          # compiler-internal scratch
        tile_budget = vmem_limit - weights_bytes - slack
        tile_budget = min(tile_budget, 28 * 1024 * 1024)  # diminishing returns past ~12 MiB/step
        tile_budget = max(tile_budget, 4 * 1024 * 1024)
        per_row = nbuf * (D * x_itemsize + 128 * 4)
        tb = tile_budget // per_row
        tb = max(8, min(tb, 32768))
        if B >= 4096:
            # Keep >= 4 grid steps so the "parallel" axis feeds both TCs (v7x).
            tb = min(tb, _round_up((B + 3) // 4, 8))
        tb = min(tb, _round_up(B, 8))
        batch_tile = max(8, (tb // 8) * 8)
    TB = batch_tile
    grid = (pl.cdiv(B, TB),)

    kernel = functools.partial(_fm_kernel, num_factors=K)

    cost = pl.CostEstimate(
        flops=int(2 * B * D * (K + 2) + 2 * B * D + 4 * B * (K + 1)),
        transcendentals=0,
        bytes_accessed=int(B * D * x_itemsize + D * (K + 2) * 4 + B * 4),
    )

    out = pl.pallas_call(
        kernel,
        out_shape=jax.ShapeDtypeStruct((B, 1), jnp.float32),
        grid_spec=pltpu.PrefetchScalarGridSpec(
            num_scalar_prefetch=0,
            grid=grid,
            in_specs=[
                pl.BlockSpec((TB, D), lambda i: (i, 0)),             # x: streamed, unpadded
                pl.BlockSpec((D, K + 2), lambda i: (0, 0)),          # weights: resident
                pl.BlockSpec(memory_space=pltpu.MemorySpace.SMEM),   # bias scalar
            ],
            out_specs=pl.BlockSpec((TB, 1), lambda i: (i, 0)),
        ),
        compiler_params=pltpu.CompilerParams(
            dimension_semantics=("parallel",),
            vmem_limit_bytes=vmem_limit,
        ),
        cost_estimate=cost,
    )(x, f_aug, bias)
    return out[:, 0]


def _fm_reference(x, w, b, factor):
    lin = (x @ w.T)[:, 0] + jnp.reshape(b, (1,))[0]
    sq_sum = (x @ factor) ** 2
    sum_sq = (x ** 2) @ (factor ** 2)
    return lin + 0.5 * jnp.sum(sq_sum - sum_sq, axis=1)


if __name__ == "__main__":
    # Small shapes consistent with FM(input_dim, output_dim).
    B, input_dim, output_dim = 8, 32, 8

    key = jax.random.PRNGKey(0)
    kx, kw, kb, kf = jax.random.split(key, 4)

    x = jax.random.normal(kx, (B, input_dim), dtype=jnp.float32)
    w = 0.01 * jax.random.normal(kw, (1, input_dim), dtype=jnp.float32)
    bias = 0.01 * jax.random.normal(kb, (1,), dtype=jnp.float32)
    factor = 0.01 * jax.random.normal(kf, (input_dim, output_dim), dtype=jnp.float32)

    y = jax.block_until_ready(fm_forward(x, w, bias, factor))
    ref = _fm_reference(x, w, bias, factor)
    assert y.shape == (B,)
    assert jnp.allclose(y, ref, atol=1e-5, rtol=1e-5)

    # Second check: multi-step grid, ragged last batch tile, feature dim not a
    # multiple of 128 (exercises the unpadded / masked-contraction path).
    B2, D2 = 600, 200
    k2x, k2w, k2b, k2f = jax.random.split(jax.random.PRNGKey(1), 4)
    x2 = jax.random.normal(k2x, (B2, D2), dtype=jnp.float32)
    w2 = 0.01 * jax.random.normal(k2w, (1, D2), dtype=jnp.float32)
    b2 = 0.01 * jax.random.normal(k2b, (1,), dtype=jnp.float32)
    f2 = 0.01 * jax.random.normal(k2f, (D2, output_dim), dtype=jnp.float32)

    y2 = jax.block_until_ready(fm_forward(x2, w2, b2, f2, batch_tile=256))
    ref2 = _fm_reference(x2, w2, b2, f2)
    assert y2.shape == (B2,)
    assert jnp.allclose(y2, ref2, atol=1e-5, rtol=1e-5)

    # Third check: auto batch-tile heuristic on an unaligned feature dim.
    y3 = jax.block_until_ready(fm_forward(x2, w2, b2, f2))
    assert jnp.allclose(y3, ref2, atol=1e-5, rtol=1e-5)

    print("KERNEL_OK")
</pallas_src>

<mosaic_0001>
module attributes {stable_mosaic.version = 11 : i64} {
  func.func @_fm_kernel(%arg0: i32, %arg1: memref<8x32xf32, #tpu.memory_space<vmem>>, %arg2: memref<32x10xf32, #tpu.memory_space<vmem>>, %arg3: memref<1xf32, #tpu.memory_space<smem>>, %arg4: memref<8x1xf32, #tpu.memory_space<vmem>>) attributes {dimension_semantics = [#tpu.dimension_semantics<parallel>], iteration_bounds = array<i64: 1>, scalar_prefetch = 0 : i64, scratch_operands = 0 : i64, tpu.core_type = #tpu.core_type<tc>, window_params = [{transform_indices = @transform_0, window_bounds = array<i64: 8, 32>}, {pipeline_mode = #tpu.pipeline_mode<synchronous>, transform_indices = @transform_1, window_bounds = array<i64: 32, 10>}, {transform_indices = @transform_2, window_bounds = array<i64: 1>}, {transform_indices = @transform_3, window_bounds = array<i64: 8, 1>}]} {
    %c0 = arith.constant 0 : index
    %c0_0 = arith.constant 0 : index
    %0 = vector.load %arg1[%c0, %c0_0] : memref<8x32xf32, #tpu.memory_space<vmem>>, vector<8x32xf32>
    %1 = arith.mulf %0, %0 : vector<8x32xf32>
    %c0_1 = arith.constant 0 : index
    %c0_2 = arith.constant 0 : index
    %2 = vector.load %arg2[%c0_1, %c0_2] : memref<32x10xf32, #tpu.memory_space<vmem>>, vector<32x10xf32>
    %cst = arith.constant dense<0.000000e+00> : vector<8x10xf32>
    %3 = tpu.matmul %0, %2, %cst {dimension_numbers = #tpu.dot_dimension_numbers<[1], [0], [0], [1], [0, 0, 1, 1], [], []>} : vector<8x32xf32>, vector<32x10xf32>, vector<8x10xf32> -> vector<8x10xf32>
    %4 = vector.extract_strided_slice %2 {offsets = [0, 9], sizes = [32, 1], strides = [1, 1]} : vector<32x10xf32> to vector<32x1xf32>
    %cst_3 = arith.constant dense<0.000000e+00> : vector<8x1xf32>
    %5 = tpu.matmul %1, %4, %cst_3 {dimension_numbers = #tpu.dot_dimension_numbers<[1], [0], [0], [1], [0, 0, 1, 1], [], []>} : vector<8x32xf32>, vector<32x1xf32>, vector<8x1xf32> -> vector<8x1xf32>
    %6 = vector.extract_strided_slice %3 {offsets = [0, 0], sizes = [8, 8], strides = [1, 1]} : vector<8x10xf32> to vector<8x8xf32>
    %7 = vector.extract_strided_slice %3 {offsets = [0, 8], sizes = [8, 1], strides = [1, 1]} : vector<8x10xf32> to vector<8x1xf32>
    %8 = arith.mulf %6, %6 : vector<8x8xf32>
    %cst_4 = arith.constant dense<0.000000e+00> : vector<8xf32>
    %9 = vector.multi_reduction <add>, %8, %cst_4 [1] : vector<8x8xf32> to vector<8xf32>
    %10 = vector.shape_cast %9 : vector<8xf32> to vector<8x1xf32>
    %11 = arith.subf %10, %5 : vector<8x1xf32>
    %cst_5 = arith.constant 5.000000e-01 : f32
    %12 = vector.broadcast %cst_5 : f32 to vector<8x1xf32>
    %13 = arith.mulf %12, %11 : vector<8x1xf32>
    %14 = arith.addf %7, %13 : vector<8x1xf32>
    %c0_6 = arith.constant 0 : index
    %15 = memref.load %arg3[%c0_6] : memref<1xf32, #tpu.memory_space<smem>>
    %16 = vector.broadcast %15 : f32 to vector<8x1xf32>
    %17 = arith.addf %14, %16 : vector<8x1xf32>
    %c0_7 = arith.constant 0 : index
    %c0_8 = arith.constant 0 : index
    %18 = vector.load %arg4[%c0_7, %c0_8] : memref<8x1xf32, #tpu.memory_space<vmem>>, vector<8x1xf32>
    tpu.vector_store %arg4[%c0_7, %c0_8], %17 {strides = array<i32>} : memref<8x1xf32, #tpu.memory_space<vmem>>, vector<8x1xf32>,
    return
  }
  func.func @transform_0(%arg0: i32) -> (i32, i32) {
    %c0_i32 = arith.constant 0 : i32
    %c0_i32_0 = arith.constant 0 : i32
    return %arg0, %c0_i32 : i32, i32
  }
  func.func @transform_1(%arg0: i32) -> (i32, i32) {
    %c0_i32 = arith.constant 0 : i32
    %c0_i32_0 = arith.constant 0 : i32
    %c0_i32_1 = arith.constant 0 : i32
    return %c0_i32, %c0_i32_0 : i32, i32
  }
  func.func @transform_2(%arg0: i32) -> i32 {
    %c0_i32 = arith.constant 0 : i32
    %c0_i32_0 = arith.constant 0 : i32
    return %c0_i32 : i32
  }
  func.func @transform_3(%arg0: i32) -> (i32, i32) {
    %c0_i32 = arith.constant 0 : i32
    %c0_i32_0 = arith.constant 0 : i32
    return %arg0, %c0_i32 : i32, i32
  }
}

</mosaic_0001>

<bundles_post_ra>
// kernel: tpu_custom_call.1
= control target key start
LH: loop header
LB: loop body
LE: loop exit
PB: predicated region body
PF: predicated region fallthrough
CT: control target
= control target key end

     0   :  { %v248_v0 = vmov 0.0   ;;  %vm249_vm0 = vmmov 0   ;;  %s250_s18 = smov 119   ;;  %vm21_vm1 = vcmask 261120   ;;  %vm185_vm2 = vcmask 64512   ;;  %s252_s24 = smov 120   ;;  %s296_s1 = inlined_call_operand.vmem [shape: f32[32,10], index: 1, kind: input, shape index: {}]   ;;  %s297_s0 = inlined_call_operand.vmem [shape: f32[8,32], index: 0, kind: input, shape index: {}]   ;;  %s298_s2 = inlined_call_operand.<no memory space> [shape: f32[1], index: 2, kind: input, shape index: {}]   ;;  %s299_s3 = inlined_call_operand.vmem [shape: f32[8,1], index: 3, kind: output, shape index: {}]  }
   0x1   :  { %221 = vmatprep.subr.mxu0 %v248_v0  ;;  %v20_v1 = vld [vmem:[%s296_s1 + $0x18] sm:$0xff]  ;;  %v19_v2 = vld [vmem:[%s296_s1 + $0x10] sm:$0xff]  ;;  %229 = vmatprep.mubr.msk.f32.mxu0 %vm249_vm0, %v248_v0  ;;  %v18_v3 = vld [vmem:[%s296_s1 + $0x8] sm:$0xff]  ;;  %v197_v20 = vstv %s298_s2  ;;  %vm203_vm3 = vcmask 7168  }
   0x2   :  { %222 = vmatpush3.msra.mxu0 %v20_v1  ;;  %105 = vrot.lane.b32.xlu0 %v20_v1, %s250_s18  ;;  %v17_v4 = vld [vmem:[%s296_s1] sm:$0xff] }
   0x3   :  { %223 = vmatprep.subr.mxu0 %v248_v0  ;;  %101 = vrot.lane.b32.xlu1 %v18_v3, %s250_s18  ;;  %v15_v5 = vld [vmem:[%s297_s0] sm:$0xff]  ;;  %s251_s0 = smov 8  }
   0x4   :  { %224 = vmatpush3.msra.mxu0 %v19_v2  ;;  %232 = vmatprep.subr.mxu1 %v248_v0  ;;  %v16_v9 = vmul.f32 %v15_v5, %v15_v5 }
   0x5   :  { %225 = vmatprep.subr.mxu0 %v248_v0  ;;  %240 = vmatprep.mubr.msk.f32.mxu1 %vm249_vm0, %v248_v0 }
   0x6   :  { %226 = vmatpush3.msra.mxu0 %v18_v3  ;;  %103 = vrot.lane.b32.xlu0 %v19_v2, %s250_s18 }
   0x7   :  { %227 = vmatprep.subr.mxu0 %v248_v0  ;;  %99 = vrot.lane.b32.xlu1 %v17_v4, %s250_s18 }
   0x8   :  { %228 = vmatpush3.msra.mxu0 %v17_v4 }
   0x9   :  { %230 = vmatmul.mubr.msk.f32.vlgmr.msra.gmra.mxu0 %vm21_vm1, %v15_v5 }
  0x74   :  { %v106_v6 = vpop.permute.xlu0 %105 }
  0x75   :  { %233 = vmatpush3.msra.mxu1 %v106_v6  ;;  %v102_v7 = vpop.permute.xlu1 %101 }
  0x76   :  { %234 = vmatprep.subr.mxu1 %v248_v0 }
  0x78   :  { %v104_v8 = vpop.permute.xlu0 %103 }
  0x79   :  { %235 = vmatpush3.msra.mxu1 %v104_v8  ;;  %v100_v10 = vpop.permute.xlu1 %99 }
  0x7a   :  { %236 = vmatprep.subr.mxu1 %v248_v0 }
  0x7b   :  { %237 = vmatpush3.msra.mxu1 %v102_v7 }
  0x7c   :  { %238 = vmatprep.subr.mxu1 %v248_v0 }
  0x7d   :  { %239 = vmatpush3.msra.mxu1 %v100_v10 }
  0x7e   :  { %241 = vmatmul.mubr.msk.f32.vlgmr.msra.gmra.mxu1 %vm21_vm1, %v16_v9 }
  0xc9   :  { %v91_v11 = vpop.f32.mrf.mxu0 }
  0xca   :  { %v184_v12 = vmul.f32 %v91_v11, %v91_v11 }
  0xcb   :  { %v231_v13 = vpop.f32.mrf.mxu0 }
  0xcc   :  { %v186_v14 = vsel %vm185_vm2, %v184_v12, 0.0 }
  0xcd   :  { %187 = vadd.xlane.f32.xlu0 %v186_v14 }
 0x13e   :  { %v180_v15 = vpop.f32.mrf.mxu1 }
 0x140   :  { %v242_v16 = vpop.f32.mrf.mxu1 }
 0x156   :  { %v188_v17 = vpop.xlane.xlu0 %187 }
 0x157   :  { %v189_v18 = vsub.f32 %v188_v17, %v180_v15 }
 0x159   :  { %v190_v19 = vmul.f32 0.5, %v189_v18 }
 0x15b   :  { %192 = vrot.lane.b32.xlu1 %v190_v19, %s251_s0 }
 0x1cd   :  { %v193_v21 = vpop.permute.xlu1 %192 }
 0x1ce   :  { %v195_v22 = vadd.f32 %v193_v21, %v91_v11 }
 0x1d0   :  { %v198_v23 = vadd.f32 %v197_v20, %v195_v22 }
 0x1d2   :  { %200 = vrot.lane.b32.xlu1 %v198_v23, %s252_s24 }
 0x244   :  { %v201_v24 = vpop.permute.xlu1 %200 }
 0x245   :  { %204 = vst.msk [vmem:[%s299_s3] sm:$0xff] %vm203_vm3, %v201_v24 }

</bundles_post_ra>
